<compile_context>
chip_gen: v6e
topology: v6e:2x2x1
jax: 0.10.0
libtpu: 0.0.40
codegen_flags: <defaults>
</compile_context>

<pallas_src>
import functools

import jax
import jax.numpy as jnp
from jax.experimental import pallas as pl
from jax.experimental.pallas import tpu as pltpu

_THETA = 0.1
_LESS_GRAD = 1.0 / (2.0 * _THETA)        # 5.0
_LESS_BIAS = _LESS_GRAD * _THETA ** 2    # 0.05
_LANE = 128
_SUB = 8
_MAX_TILE_ROWS = 2048                    # 2048*128*4B = 1 MiB per input block
_NCORES = 2                              # leading "parallel" axis (v7x megacore); harmless on 1-TC chips


def _adjust_smooth_l1(y):
    less = (y < _THETA).astype(jnp.float32)
    return less * y * y * _LESS_GRAD + (1.0 - less) * (y - _THETA + _LESS_BIAS)


def _round_up(x, m):
    return ((x + m - 1) // m) * m


# ---------------- kernel ----------------

def _loss_sum_kernel(p_ref, t_ref, *rest, mode, margin, total_rows, tile_rows,
                     blocks_per_core, need_mask, weighted):
    """Streams (tile_rows, 128) tiles and accumulates per-core partial sums into
    lane-shaped (1, 1, 128) f32 output blocks: sum(loss[*w]) and, if weighted, sum(w)."""
    if weighted:
        w_ref, loss_acc_ref, w_acc_ref = rest
    else:
        w_ref, w_acc_ref = None, None
        (loss_acc_ref,) = rest

    c = pl.program_id(0)
    i = pl.program_id(1)

    @pl.when(i == 0)
    def _init():
        loss_acc_ref[...] = jnp.zeros_like(loss_acc_ref)
        if weighted:
            w_acc_ref[...] = jnp.zeros_like(w_acc_ref)

    # dtype cast in VMEM (not in the wrapper): saves HBM traffic for bf16/int inputs.
    p = p_ref[...].astype(jnp.float32)
    t = t_ref[...].astype(jnp.float32)

    if mode == "l1":
        loss = _adjust_smooth_l1(jnp.abs(t - p))
    else:  # "hinge": single-channel FG/BG margin loss
        is_fg = (t > 0.5).astype(jnp.float32)
        loss0 = _adjust_smooth_l1(jnp.maximum(p, 0.0))
        loss1 = _adjust_smooth_l1(jnp.maximum(margin - p, 0.0))
        loss = loss0 * (1.0 - is_fg) + loss1 * is_fg

    if weighted:
        w = w_ref[...].astype(jnp.float32)
        contrib = loss * w
    else:
        w = None
        contrib = loss

    if need_mask:
        # Zero out rows past the true row count (partial tail tile / extra grid slots).
        blk = c * blocks_per_core + i  # unclamped global block index
        row = blk * tile_rows + jax.lax.broadcasted_iota(
            jnp.int32, (tile_rows, _LANE), 0)
        valid = row < total_rows
        contrib = jnp.where(valid, contrib, 0.0)
        if weighted:
            w = jnp.where(valid, w, 0.0)

    # Sublane-axis reduce only (VPU adds + tiny in-vreg fold); the final 128-lane
    # reduce happens once on the tiny per-core partials in the wrapper.
    loss_acc_ref[...] += jnp.sum(contrib, axis=0, keepdims=True)[None]
    if weighted:
        w_acc_ref[...] += jnp.sum(w, axis=0, keepdims=True)[None]


# ---------------- pallas_call wrapper ----------------

def _to_rows(x):
    """Flatten to a lane-dense (rows, 128) slab. Free (pure reshape) whenever
    numel % 128 == 0; otherwise the flat tail is zero-padded by < 128 elements."""
    flat = x.reshape(-1)
    n = flat.shape[0]
    pad = (-n) % _LANE
    if pad:
        # TODO(synk): only hit when numel % 128 != 0; costs one XLA pad copy.
        flat = jnp.pad(flat, (0, pad))
    return flat.reshape(-1, _LANE)


def _reduce_sum(p2d, t2d, w2d, *, mode, margin):
    """Returns (sum(loss * w), sum(w)) over all true elements. If w2d is None the
    weight is an implicit 1 (no ones array is read) and the second value is None."""
    rows = p2d.shape[0]
    weighted = w2d is not None

    tile_rows = min(_MAX_TILE_ROWS, _round_up(pl.cdiv(rows, _NCORES), _SUB))
    num_blocks = pl.cdiv(rows, tile_rows)
    blocks_per_core = pl.cdiv(num_blocks, _NCORES)
    need_mask = (_NCORES * blocks_per_core * tile_rows != rows)

    def data_idx(c, i):
        # Clamp so out-of-range (core, step) slots re-read the last block; their
        # contribution is zeroed by the in-kernel row mask.
        return (jnp.minimum(c * blocks_per_core + i, num_blocks - 1), 0)

    data_spec = pl.BlockSpec((tile_rows, _LANE), data_idx)
    acc_spec = pl.BlockSpec((1, 1, _LANE), lambda c, i: (c, 0, 0))
    acc_shape = jax.ShapeDtypeStruct((_NCORES, 1, _LANE), jnp.float32)

    kernel = functools.partial(
        _loss_sum_kernel, mode=mode, margin=float(margin), total_rows=rows,
        tile_rows=tile_rows, blocks_per_core=blocks_per_core,
        need_mask=need_mask, weighted=weighted)

    if weighted:
        in_specs = [data_spec, data_spec, data_spec]
        out_specs = (acc_spec, acc_spec)
        out_shape = (acc_shape, acc_shape)
        inputs = (p2d, t2d, w2d)
    else:
        in_specs = [data_spec, data_spec]
        out_specs = acc_spec
        out_shape = acc_shape
        inputs = (p2d, t2d)

    out = pl.pallas_call(
        kernel,
        out_shape=out_shape,
        grid_spec=pltpu.PrefetchScalarGridSpec(
            num_scalar_prefetch=0,
            grid=(_NCORES, blocks_per_core),
            in_specs=in_specs,
            out_specs=out_specs,
        ),
        compiler_params=pltpu.CompilerParams(
            dimension_semantics=("parallel", "arbitrary")),
    )(*inputs)

    if weighted:
        loss_acc, w_acc = out
        return jnp.sum(loss_acc), jnp.sum(w_acc)
    return jnp.sum(out), None


def binary_loss(preds, targets, weights=None, *, margin=2.0, FG_stCH=1):
    """JAX/Pallas equivalent of BinaryLoss.forward (default 'l1' config).

    preds/targets: [bs, ch, ht, wd]; weights: None or [bs, 1, ht, wd].
    Returns a float32 scalar.
    """
    bs, ch, ht, wd = preds.shape

    if ch > 1:
        # loss_type == 'l1' on the first FG_stCH channels.
        # TODO(synk): the 'CE' path (FG_stCH > 1, loss_type='CE') is not implemented;
        # it is unreachable with the module's default config (FG_stCH == 1 forces 'l1').
        fg = min(FG_stCH, ch)
        if weights is None:
            p0 = preds if fg == ch else preds[:, :fg]
            t0 = targets if fg == ch else targets[:, :fg]
            loss_sum, _ = _reduce_sum(_to_rows(p0), _to_rows(t0), None,
                                      mode="l1", margin=margin)
            return (loss_sum / jnp.float32(bs * ht * wd)).astype(jnp.float32)
        # Weighted: loop channels so the single-channel weight map is streamed per
        # channel instead of materializing a broadcast copy in HBM.
        w2d = _to_rows(weights)
        loss_sum = jnp.float32(0.0)
        w_sum = None
        for c in range(fg):
            pc = preds[:, c:c + 1]
            tc = targets[:, c:c + 1]
            s, ws = _reduce_sum(_to_rows(pc), _to_rows(tc), w2d,
                                mode="l1", margin=margin)
            loss_sum = loss_sum + s
            if w_sum is None:
                w_sum = ws
        return (loss_sum / (w_sum + 0.0001)).astype(jnp.float32)

    # ch == 1: hinge-style FG/BG loss with margin.
    if weights is None:
        loss_sum, _ = _reduce_sum(_to_rows(preds), _to_rows(targets), None,
                                  mode="hinge", margin=margin)
        return (loss_sum / jnp.float32(bs * ht * wd)).astype(jnp.float32)
    loss_sum, w_sum = _reduce_sum(_to_rows(preds), _to_rows(targets),
                                  _to_rows(weights), mode="hinge", margin=margin)
    return (loss_sum / (w_sum + 0.0001)).astype(jnp.float32)


# ---------------- pure-JAX reference (for silent self-check) ----------------

def _binary_loss_ref(preds, targets, weights=None, *, margin=2.0, FG_stCH=1):
    bs, ch, ht, wd = preds.shape
    if ch > 1:
        p0 = preds[:, :FG_stCH].astype(jnp.float32)
        t0 = targets[:, :FG_stCH].astype(jnp.float32)
        loss = _adjust_smooth_l1(jnp.abs(t0 - p0)).sum(axis=1, keepdims=True)
    else:
        is_fg = (targets > 0.5).astype(jnp.float32)
        l0 = _adjust_smooth_l1(jnp.maximum(preds, 0.0))
        l1 = _adjust_smooth_l1(jnp.maximum(margin - preds, 0.0))
        loss = l0 * (1.0 - is_fg) + l1 * is_fg
    if weights is not None:
        return (loss * weights).sum() / (weights.sum() + 0.0001)
    return loss.mean()


if __name__ == "__main__":
    key = jax.random.PRNGKey(0)
    k1, k2, k3, k4, k5, k6, k7 = jax.random.split(key, 7)

    bs, ch, ht, wd = 2, 4, 16, 16
    # softmax2d-like predictions (expected by the 'l1' path), binary-ish targets
    preds = jax.nn.softmax(jax.random.normal(k1, (bs, ch, ht, wd), jnp.float32), axis=1)
    targets = (jax.random.uniform(k2, (bs, ch, ht, wd)) > 0.5).astype(jnp.float32)
    weights = jax.random.uniform(k3, (bs, 1, ht, wd), jnp.float32)

    # ch > 1, 'l1' branch: unweighted, weighted, and FG_stCH=2 weighted (weight-revisit path)
    out_a = jax.block_until_ready(binary_loss(preds, targets))
    out_b = jax.block_until_ready(binary_loss(preds, targets, weights))
    out_c = jax.block_until_ready(binary_loss(preds, targets, weights, FG_stCH=2))

    # ch == 1 branch: unweighted and weighted
    preds1 = jax.random.normal(k4, (bs, 1, ht, wd), jnp.float32) * 2.0
    targets1 = (jax.random.uniform(k5, (bs, 1, ht, wd)) > 0.5).astype(jnp.float32)
    out_d = jax.block_until_ready(binary_loss(preds1, targets1))
    out_e = jax.block_until_ready(binary_loss(preds1, targets1, weights))

    # Larger ch == 1 case exercising both parallel-core blocks + partial tail masking
    # (2*1*64*100 = 12800 elements -> 100 rows of 128, tile_rows = 56, 2 blocks).
    preds2 = jax.random.normal(k6, (2, 1, 64, 100), jnp.float32) * 2.0
    targets2 = (jax.random.uniform(k7, (2, 1, 64, 100)) > 0.5).astype(jnp.float32)
    out_f = jax.block_until_ready(binary_loss(preds2, targets2))

    checks = [
        (out_a, _binary_loss_ref(preds, targets)),
        (out_b, _binary_loss_ref(preds, targets, weights)),
        (out_c, _binary_loss_ref(preds, targets, weights, FG_stCH=2)),
        (out_d, _binary_loss_ref(preds1, targets1)),
        (out_e, _binary_loss_ref(preds1, targets1, weights)),
        (out_f, _binary_loss_ref(preds2, targets2)),
    ]
    for got, want in checks:
        assert jnp.allclose(got, want, rtol=1e-5, atol=1e-6), (got, want)

    print("KERNEL_OK")
</pallas_src>

<mosaic_0001>
module attributes {stable_mosaic.version = 11 : i64} {
  func.func @_loss_sum_kernel(%arg0: i32, %arg1: i32, %arg2: memref<8x128xf32, #tpu.memory_space<vmem>>, %arg3: memref<8x128xf32, #tpu.memory_space<vmem>>, %arg4: memref<1x1x128xf32, #tpu.memory_space<vmem>>) attributes {dimension_semantics = [#tpu.dimension_semantics<parallel>, #tpu.dimension_semantics<arbitrary>], iteration_bounds = array<i64: 2, 1>, scalar_prefetch = 0 : i64, scratch_operands = 0 : i64, tpu.core_type = #tpu.core_type<tc>, window_params = [{transform_indices = @transform_0, window_bounds = array<i64: 8, 128>}, {transform_indices = @transform_1, window_bounds = array<i64: 8, 128>}, {transform_indices = @transform_2, window_bounds = array<i64: 1, 1, 128>}]} {
    %c0_i32 = arith.constant 0 : i32
    %0 = arith.cmpi eq, %arg1, %c0_i32 : i32
    %1 = arith.extui %0 : i1 to i32
    %c0_i32_0 = arith.constant 0 : i32
    %2 = arith.cmpi ne, %1, %c0_i32_0 : i32
    scf.if %2 {
      %cst_16 = arith.constant 0.000000e+00 : f32
      %39 = vector.broadcast %cst_16 : f32 to vector<1x1x128xf32>
      %c0_17 = arith.constant 0 : index
      %c0_18 = arith.constant 0 : index
      %c0_19 = arith.constant 0 : index
      %40 = vector.load %arg4[%c0_17, %c0_18, %c0_19] : memref<1x1x128xf32, #tpu.memory_space<vmem>>, vector<1x1x128xf32>
      tpu.vector_store %arg4[%c0_17, %c0_18, %c0_19], %39 {strides = array<i32>} : memref<1x1x128xf32, #tpu.memory_space<vmem>>, vector<1x1x128xf32>,
    } else {
    }
    %c0 = arith.constant 0 : index
    %c0_1 = arith.constant 0 : index
    %3 = vector.load %arg2[%c0, %c0_1] : memref<8x128xf32, #tpu.memory_space<vmem>>, vector<8x128xf32>
    %c0_2 = arith.constant 0 : index
    %c0_3 = arith.constant 0 : index
    %4 = vector.load %arg3[%c0_2, %c0_3] : memref<8x128xf32, #tpu.memory_space<vmem>>, vector<8x128xf32>
    %5 = arith.subf %4, %3 : vector<8x128xf32>
    %6 = math.absf %5 : vector<8x128xf32>
    %cst = arith.constant 1.000000e-01 : f32
    %7 = vector.broadcast %cst : f32 to vector<8x128xf32>
    %8 = arith.cmpf olt, %6, %7 : vector<8x128xf32>
    %9 = arith.extui %8 : vector<8x128xi1> to vector<8x128xi32>
    %10 = arith.sitofp %9 : vector<8x128xi32> to vector<8x128xf32>
    %11 = arith.mulf %10, %6 : vector<8x128xf32>
    %12 = arith.mulf %11, %6 : vector<8x128xf32>
    %cst_4 = arith.constant 5.000000e+00 : f32
    %13 = vector.broadcast %cst_4 : f32 to vector<8x128xf32>
    %14 = arith.mulf %12, %13 : vector<8x128xf32>
    %cst_5 = arith.constant 1.000000e+00 : f32
    %15 = vector.broadcast %cst_5 : f32 to vector<8x128xf32>
    %16 = arith.subf %15, %10 : vector<8x128xf32>
    %cst_6 = arith.constant 1.000000e-01 : f32
    %17 = vector.broadcast %cst_6 : f32 to vector<8x128xf32>
    %18 = arith.subf %6, %17 : vector<8x128xf32>
    %cst_7 = arith.constant 5.000000e-02 : f32
    %19 = vector.broadcast %cst_7 : f32 to vector<8x128xf32>
    %20 = arith.addf %18, %19 : vector<8x128xf32>
    %21 = arith.mulf %16, %20 : vector<8x128xf32>
    %22 = arith.addf %14, %21 : vector<8x128xf32>
    %c1_i32 = arith.constant 1 : i32
    %23 = arith.muli %arg0, %c1_i32 : i32
    %24 = arith.addi %23, %arg1 : i32
    %c8_i32 = arith.constant 8 : i32
    %25 = arith.muli %24, %c8_i32 : i32
    %26 = tpu.iota {dimensions = array<i32: 0>} : vector<8x128xi32>
    %27 = vector.broadcast %25 : i32 to vector<8x128xi32>
    %28 = arith.addi %27, %26 : vector<8x128xi32>
    %c4_i32 = arith.constant 4 : i32
    %29 = vector.broadcast %c4_i32 : i32 to vector<8x128xi32>
    %30 = arith.cmpi slt, %28, %29 : vector<8x128xi32>
    %cst_8 = arith.constant 0.000000e+00 : f32
    %31 = vector.broadcast %cst_8 : f32 to vector<8x128xf32>
    %32 = arith.select %30, %22, %31 : vector<8x128xi1>, vector<8x128xf32>
    %c0_9 = arith.constant 0 : index
    %c0_10 = arith.constant 0 : index
    %c0_11 = arith.constant 0 : index
    %33 = vector.load %arg4[%c0_9, %c0_10, %c0_11] : memref<1x1x128xf32, #tpu.memory_space<vmem>>, vector<1x1x128xf32>
    %cst_12 = arith.constant dense<0.000000e+00> : vector<128xf32>
    %34 = vector.multi_reduction <add>, %32, %cst_12 [0] : vector<8x128xf32> to vector<128xf32>
    %35 = vector.shape_cast %34 : vector<128xf32> to vector<1x128xf32>
    %36 = vector.shape_cast %35 : vector<1x128xf32> to vector<1x1x128xf32>
    %37 = arith.addf %33, %36 : vector<1x1x128xf32>
    %c0_13 = arith.constant 0 : index
    %c0_14 = arith.constant 0 : index
    %c0_15 = arith.constant 0 : index
    %38 = vector.load %arg4[%c0_13, %c0_14, %c0_15] : memref<1x1x128xf32, #tpu.memory_space<vmem>>, vector<1x1x128xf32>
    tpu.vector_store %arg4[%c0_13, %c0_14, %c0_15], %37 {strides = array<i32>} : memref<1x1x128xf32, #tpu.memory_space<vmem>>, vector<1x1x128xf32>,
    return
  }
  func.func @transform_0(%arg0: i32, %arg1: i32) -> (i32, i32) {
    %c1_i32 = arith.constant 1 : i32
    %0 = arith.muli %arg0, %c1_i32 : i32
    %1 = arith.addi %0, %arg1 : i32
    %c0_i32 = arith.constant 0 : i32
    %2 = arith.minsi %1, %c0_i32 : i32
    %c0_i32_0 = arith.constant 0 : i32
    %c0_i32_1 = arith.constant 0 : i32
    return %2, %c0_i32_0 : i32, i32
  }
  func.func @transform_1(%arg0: i32, %arg1: i32) -> (i32, i32) {
    %c1_i32 = arith.constant 1 : i32
    %0 = arith.muli %arg0, %c1_i32 : i32
    %1 = arith.addi %0, %arg1 : i32
    %c0_i32 = arith.constant 0 : i32
    %2 = arith.minsi %1, %c0_i32 : i32
    %c0_i32_0 = arith.constant 0 : i32
    %c0_i32_1 = arith.constant 0 : i32
    return %2, %c0_i32_0 : i32, i32
  }
  func.func @transform_2(%arg0: i32, %arg1: i32) -> (i32, i32, i32) {
    %c0_i32 = arith.constant 0 : i32
    %c0_i32_0 = arith.constant 0 : i32
    %c0_i32_1 = arith.constant 0 : i32
    return %arg0, %c0_i32, %c0_i32_0 : i32, i32, i32
  }
}

</mosaic_0001>

<bundles_post_ra>
// kernel: tpu_custom_call.1
= control target key start
LH: loop header
LB: loop body
LE: loop exit
PB: predicated region body
PF: predicated region fallthrough
CT: control target
= control target key end

     0   :  { %7 = vsyncpa [#allocation3], 0  ;;  %s863_s0 = inlined_call_operand.hbm [shape: f32[4,128], index: 0, kind: input, shape index: {}]   ;;  %s864_s1 = inlined_call_operand.hbm [shape: f32[4,128], index: 1, kind: input, shape index: {}]   ;;  %s865_s2 = inlined_call_operand.hbm [shape: f32[2,1,128], index: 2, kind: output, shape index: {}]  }
   0x1   :  { %9 = vsyncpa [#allocation3 + $0x1], 0 }
   0x2   :  { %10 = vsyncpa [#allocation6], 0 }
   0x3   :  { %12 = vsyncpa [#allocation6 + $0x1], 0 }
   0x4   :  { %13 = vsyncpa [#allocation4], 0 }
   0x5   :  { %15 = vsyncpa [#allocation4 + $0x1], 0  ;;  %s699_s9 = smov 0   ;;  %s701_s10 = smov 0  }
   0x6   :  { %s703_s11 = smov 0   ;;  %s705_s12 = smov 0  }
   0x7   :  { %s707_s13 = smov 0   ;;  %s709_s14 = smov 0  }
   0x8   :  { %s711_s15 = smov 0   ;;  %s713_s16 = smov 0  }
   0x9 LB: > { %s398_s17 = sadd.s32 4294967295, %s674_s16   ;;  %s399_s18 = sadd.s32 4294967294, %s674_s16   ;;  %s674_s16 = sphi %s713_s16, %s21_s16   ;;  %s670_s15 = sphi %s711_s15, %s877_s15   ;;  %s666_s14 = sphi %s709_s14, %s876_s14   ;;  %s662_s13 = sphi %s707_s13, %s853_s13   ;;  %s658_s12 = sphi %s705_s12, %s875_s12   ;;  %s654_s11 = sphi %s703_s11, %s874_s11   ;;  %s650_s10 = sphi %s701_s10, %s873_s10   ;;  %s646_s9 = sphi %s699_s9, %s872_s9  }
   0xa   : > { %s33_s19 = sadd.s32 1, %s670_s15  ;;  %p643_p1 = scmp.ne.s32.totalorder %s662_s13, 0 }
   0xb   : > { %p35_p0 = scmp.ge.s32.totalorder %s33_s19, 2  ;;  %p54_p2 = scmp.eq.s32.totalorder %s674_s16, 0 }
   0xc   : > { %p59_p3 = scmp.ne.s32.totalorder %s662_s13, %s658_s12  ;;  %p60_p5 = scmp.eq.s32.totalorder %s398_s17, 0 }
   0xd   : > { %s879_s19 = smov (%p35_p0, %s33_s19), 0  ;;  %p745_p4 = por %p643_p1, %p54_p2 }
   0xe   : > { %p749_p6 = por %p60_p5, %p59_p3  ;;  %s101_s22 = ssub.s32 %s670_s15, %s879_s19 }
   0xf   : > { %p102_p7 = scmp.eq.s32.totalorder %s101_s22, 0  ;;  %s104_s23 = sadd.s32 1, %s654_s11 }
  0x10   : > { %p114_p8 = scmp.ne.s32.totalorder %s654_s11, %s650_s10  ;;  %p115_p9 = scmp.eq.s32.totalorder %s398_s17, 1 }
  0x11   : > { %s757_s24 = scalar_select %p102_p7, %s654_s11, %s104_s23  }
  0x12   : > { %p120_p10 = scmp.ne.s32.totalorder %s650_s10, %s646_s9  ;;  %p121_p11 = scmp.eq.s32.totalorder %s399_s18, 1 }
  0x13   : > { %p763_p12 = por %p115_p9, %p114_p8  ;;  %p866_p0 = scmp.ge.s32.totalorder %s674_s16, 2 }
  0x14   : > { %p767_p13 = por %p121_p11, %p120_p10 }
  0x15   : > { %137 = sbr.rel (%p866_p0) target bundleno = 72 (0x48), region = 16 }
  0x1a   : > { %140 = sbr.rel (!%p745_p4) target bundleno = 49 (0x31), region = 20 }
  0x1f   : > { %154 = vsyncadd [#allocation3], 64  ;;  %s676_s27 = smov [#allocation2]   ;;  %s513_s3 = scalar_lea.hbm %s863_s0, 64 }
  0x20   : > { %s159_s28 = sshll.u32 %s676_s27, 4  ;;  %p514_p1 = scmp.ne.s32.totalorder %s863_s0, %s513_s3  ;;  %s160_s28 = int_to_ptr.vmem [resolvable:$true] %s159_s28 }
  0x21   : > { %p519_p2 = scmp.lt.s32.totalorder %s513_s3, %s513_s3 }
  0x23   : > { %p521_p3 = pnand %p519_p2, %p514_p1 }
  0x25   : > { %524 = shalt.err (!%p521_p3)
}
  0x26   : > { %s525_s6 = scalar_lea.vmem %s160_s28, 64  ;;  %s531_s7 = scalar_lea.vmem %s160_s28, 256 }
  0x27   : > { %p526_p5 = scmp.ne.s32.totalorder %s160_s28, %s525_s6  ;;  %p532_p7 = scmp.lt.s32.totalorder %s160_s28, %s160_s28 }
  0x28   : > { %p533_p8 = scmp.lt.s32.totalorder %s531_s7, %s525_s6 }
  0x2a   : > { %p534_p9 = por %p533_p8, %p532_p7 }
  0x2c   : > { %p535_p10 = pnand %p534_p9, %p526_p5 }
  0x2e   : > { %538 = shalt.err (!%p535_p10)
}
  0x2f   : > { %s677_s8 = smov 64   ;;  %s678_s12 = smov 4  }
  0x30   : > { %165 = dma.hbm_to_vmem [thread:$0]  %s863_s0, 64, %s160_s28, [#allocation3], %s677_s8, %s677_s8, %s678_s12  }
  0x31 PF: > { %168 = sbr.rel (!%p745_p4) target bundleno = 72 (0x48), region = 24 }
  0x36   : > { %182 = vsyncadd [#allocation6], 64  ;;  %s679_s22 = smov [#allocation5]   ;;  %s539_s30 = scalar_lea.hbm %s864_s1, 64 }
  0x37   : > { %s187_s23 = sshll.u32 %s679_s22, 4  ;;  %p540_p11 = scmp.ne.s32.totalorder %s864_s1, %s539_s30  ;;  %s188_s23 = int_to_ptr.vmem [resolvable:$true] %s187_s23 }
  0x38   : > { %p545_p1 = scmp.lt.s32.totalorder %s539_s30, %s539_s30 }
  0x3a   : > { %p547_p2 = pnand %p545_p1, %p540_p11 }
  0x3c   : > { %550 = shalt.err (!%p547_p2)
}
  0x3d   : > { %s551_s28 = scalar_lea.vmem %s188_s23, 64  ;;  %s557_s5 = scalar_lea.vmem %s188_s23, 256 }
  0x3e   : > { %p552_p3 = scmp.ne.s32.totalorder %s188_s23, %s551_s28  ;;  %p558_p5 = scmp.lt.s32.totalorder %s188_s23, %s188_s23 }
  0x3f   : > { %p559_p4 = scmp.lt.s32.totalorder %s557_s5, %s551_s28 }
  0x41   : > { %p560_p7 = por %p559_p4, %p558_p5 }
  0x43   : > { %p561_p8 = pnand %p560_p7, %p552_p3 }
  0x45   : > { %564 = shalt.err (!%p561_p8)
}
  0x46   : > { %s680_s20 = smov 64   ;;  %s681_s6 = smov 4  }
  0x47   : > { %193 = dma.hbm_to_vmem [thread:$0]  %s864_s1, 64, %s188_s23, [#allocation6], %s680_s20, %s680_s20, %s681_s6  }
  0x48 PF: > { %p416_p9 = scmp.ge.s32.totalorder %s674_s16, 1  ;;  %p195_p10 = scmp.lt.s32.totalorder %s674_s16, 3 }
  0x4a   : > { %p196_p11 = pnand %p416_p9, %p195_p10 }
  0x4b   : > { %s201_s12 = sand.u32 (!%p196_p11), 1, %s662_s13  }
  0x4c   : > { %199 = sbr.rel (%p196_p11) target bundleno = 127 (0x7f), region = 28  ;;  %s417_s17 = sshll.u32 (!%p196_p11), %s201_s12, 3 }
  0x4d   : > { %s202_s18 = scalar_lea.sflag (!%p196_p11), [#allocation3], %s201_s12  ;;  %s205_s22 = scalar_lea.vmem (!%p196_p11), [#allocation2], %s417_s17 }
  0x51   : > { %628 = dma.done.wait (%p749_p6), %s202_s18, 128  }
  0x52   : > { %630 = vsyncadd (%p749_p6), %s202_s18, 4294967168  ;;  %s211_s23 = scalar_lea.sflag [#allocation6], %s201_s12  ;;  %s214_s27 = scalar_lea.vmem [#allocation5], %s417_s17 }
  0x53   : > { %632 = dma.done.wait (%p749_p6), %s211_s23, 128  }
  0x54   : > { %634 = vsyncadd (%p749_p6), %s211_s23, 4294967168  ;;  %s237_s29 = sand.u32 1, %s650_s10   ;;  %v682_v0 = vmov 0.0   ;;  %v256_v1 = vld [vmem:[%s205_s22] sm:$0xff]  ;;  %v257_v2 = vld [vmem:[%s214_s27] sm:$0xff]  ;;  %v273_v3 = vlaneseq  ;;  %s421_s3 = sshll.u32 %s666_s14, 3 }
  0x55   : > { %s810_s30 = scalar_lea.vmem [#allocation7], %s237_s29  ;;  %v258_v4 = vsub.f32 %v257_v2, %v256_v1  ;;  %v275_v8 = vstv %s421_s3  ;;  %s422_s21 = sshll.u32 %s666_s14, 4 }
  0x56   : > { %255 = vst [vmem:[%s810_s30] sm:$0x1] %v682_v0  ;;  %v274_v6 = vshrl.u32 %v273_v3, 7  ;;  %s301_s4 = sshll.u32 %s810_s30, 4  ;;  %s299_s20 = scalar_lea.hbm %s865_s2, %s422_s21  ;;  %s302_s4 = int_to_ptr.vmem [resolvable:$true] %s301_s4 }
  0x57   : > { %v259_v5 = vand.u32 2147483647, %v258_v4  ;;  %s289_s6 = scalar_lea.sflag [#allocation4], %s237_s29  ;;  %s565_s7 = scalar_lea.vmem %s302_s4, 16 }
  0x58   : > { %v276_v13 = vadd.s32 %v275_v8, %v274_v6  ;;  %p566_p6 = scmp.ne.s32.totalorder %s302_s4, %s565_s7  ;;  %s683_s8 = smov [#allocation7]  }
  0x59   : > { %vm260_vm0 = vcmp.lt.f32.partialorder %v259_v5, 0.1  ;;  %v420_v7 = vadd.f32 -0.1, %v259_v5  ;;  %s569_s12 = sshll.u32 %s683_s8, 4  ;;  %s570_s12 = int_to_ptr.vmem [resolvable:$false] %s569_s12 }
  0x5a   : > { %v419_v9 = vsel %vm260_vm0, 1.0, %v682_v0  ;;  %vm277_vm1 = vcmp.lt.s32.totalorder %v276_v13, 4  ;;  %p567_p1 = pnand %p566_p6, %p763_p12  ;;  %s571_s14 = scalar_lea.vmem %s570_s12, 32 }
  0x5b   : > { %v263_v10 = vmul.f32 %v419_v9, %v259_v5  ;;  %v266_v11 = vsub.f32 1.0, %v419_v9  ;;  %v268_v12 = vadd.f32 0.05, %v420_v7  ;;  %p572_p3 = scmp.lt.s32.totalorder %s302_s4, %s570_s12  ;;  %p573_p5 = scmp.lt.s32.totalorder %s571_s14, %s565_s7 }
  0x5c   : > { %p568_p2 = pneg %p567_p1 }
  0x5d   : > { %v264_v14 = vmul.f32 %v263_v10, %v259_v5  ;;  %v269_v15 = vmul.f32 %v268_v12, %v266_v11  ;;  %v279_v24 = vld [vmem:[%s810_s30] sm:$0x1]  ;;  %p574_p4 = por %p573_p5, %p572_p3 }
  0x5f   : > { %v265_v16 = vmul.f32 5.0, %v264_v14  ;;  %p575_p7 = pnand %p574_p4, %p568_p2 }
  0x61   : > { %v270_v17 = vadd.f32 %v269_v15, %v265_v16 }
  0x63   : > { %v278_v18 = vsel %vm277_vm1, %v270_v17, 0.0 }
  0x64   : > { %v280_v19 = vrot.slane %v278_v18, 4 }
  0x66   : > { %v281_v20 = vadd.f32 %v280_v19, %v278_v18 }
  0x68   : > { %v282_v21 = vrot.slane %v281_v20, 2 }
  0x6a   : > { %v283_v22 = vadd.f32 %v282_v21, %v281_v20 }
  0x6c   : > { %v284_v23 = vrot.slane %v283_v22, 1 }
  0x6e   : > { %v285_v25 = vadd.f32 %v284_v23, %v283_v22 }
  0x70   : > { %v286_v26 = vadd.f32 %v285_v25, %v279_v24 }
  0x72   : > { %287 = vst [vmem:[%s810_s30] sm:$0x1] %v286_v26 }
  0x73   : > { %578 = shalt.err (!%p575_p7)
}
  0x74   : > { %s579_s17 = scalar_lea.hbm %s299_s20, 16  ;;  %s583_s23 = scalar_lea.hbm %s865_s2, 32 }
  0x75   : > { %p580_p8 = scmp.ne.s32.totalorder %s299_s20, %s579_s17  ;;  %p584_p11 = scmp.lt.s32.totalorder %s299_s20, %s865_s2 }
  0x76   : > { %p585_p6 = scmp.lt.s32.totalorder %s583_s23, %s579_s17 }
  0x77   : > { %p581_p9 = pnand %p580_p8, %p763_p12 }
  0x78   : > { %p586_p1 = por %p585_p6, %p584_p11 }
  0x79   : > { %p582_p10 = pneg %p581_p9 }
  0x7b   : > { %p587_p0 = pnand %p586_p1, %p582_p10 }
  0x7d   : > { %590 = shalt.err (!%p587_p0)
}
  0x7e   : > { %429 = dma.vmem_to_hbm [thread:$0]  (%p763_p12), %s302_s4, 16, %s299_s20, %s289_s6  }
  0x7f PF: > { %s313_s30 = sand.u32 1, %s646_s9   ;;  %p871_p2 = scmp.ge.s32.totalorder %s674_s16, 2 }
  0x80   : > { %s314_s3 = scalar_lea.sflag [#allocation4], %s313_s30 }
  0x81   : > { %p432_p3 = pnand %p871_p2, %p767_p13 }
  0x83   : > { %p433_p5 = pneg %p432_p3 }
  0x85   : > { %636 = dma.done.wait (%p433_p5), %s314_s3, 16  }
  0x86   : > { %638 = vsyncadd (%p433_p5), %s314_s3, 4294967280  ;;  %s21_s16 = sadd.s32 1, %s674_s16   ;;  %s872_s9 = smov %s650_s10 }
  0x87   : > { %p18_p4 = scmp.ge.s32.totalorder %s21_s16, 4   ;;  %s873_s10 = smov %s654_s11 }
  0x88   : > { %s874_s11 = smov %s757_s24  ;;  %s875_s12 = smov %s662_s13 }
  0x89   : > { %s853_s13 = smov 0   ;;  %s876_s14 = smov %s670_s15 }
  0x8a   : > { %s877_s15 = smov %s879_s19  ;;  %20 = sbr.rel (!%p18_p4) target bundleno = 9 (0x9), region = 90 }
  0x8f   :  { %318 = vsyncpa [#allocation3], 1 }
  0x90   :  { %320 = vsyncpa [#allocation3 + $0x1], 1 }
  0x91   :  { %321 = vsyncpa [#allocation6], 1 }
  0x92   :  { %323 = vsyncpa [#allocation6 + $0x1], 1 }
  0x93   :  { %324 = vsyncpa [#allocation4], 1 }
  0x94   :  { %326 = vsyncpa [#allocation4 + $0x1], 1 }

</bundles_post_ra>
